<compile_context>
chip_gen: v7x
topology: tpu7x:2x2x1
jax: 0.10.0
libtpu: 0.0.40
codegen_flags: <defaults>
</compile_context>

<pallas_src>
import math

import jax
import jax.numpy as jnp
import numpy as np
from jax.experimental import pallas as pl
from jax.experimental.pallas import tpu as pltpu

_LOG_2PI = math.log(2.0 * math.pi)


def _flow_logprob_kernel(x_ref, ctx_ref, mean_ref, inv_std_ref, w_ref, b_ref,
                         out_ref):
    D = mean_ref.shape[-1]

    # ---- standardizer: multiply by precomputed 1/std (no per-element divide) ----
    z = (x_ref[...] - mean_ref[...]) * inv_std_ref[...]                   # [TB, D]

    # ---- fused conditional affine heads: one MXU matmul -> [TB, 2D] -------------
    affine = jnp.dot(ctx_ref[...], w_ref[...],
                     preferred_element_type=jnp.float32) + b_ref[...]     # [TB, 2D]
    shift = affine[:, :D]                                                 # [TB, D]
    log_scale = affine[:, D:]                                             # [TB, D]

    u = (z - shift) * jnp.exp(-log_scale)                                 # [TB, D]

    # ---- single fused feature-axis reduction (base log-prob + log|det J|) ------
    t = -0.5 * (u * u) - log_scale                                        # [TB, D]
    lp = jnp.sum(t, axis=-1, keepdims=True) - (0.5 * D * _LOG_2PI)        # [TB, 1]

    out_ref[...] = lp.astype(out_ref.dtype)


def flow_wrapper_log_prob(x, context, mean, std, w_shift, b_shift, w_scale,
                          b_scale, *, tb=1024):
    """Pallas-backed equivalent of FlowWrapper.forward(x, context) -> log_prob [B]."""
    B, D = x.shape
    C = context.shape[1]

    # One-time parameter prep (plain JAX): fuse the two heads, precompute 1/std.
    w_cat = jnp.concatenate([w_shift, w_scale], axis=1)      # [C, 2D]
    b_cat = jnp.concatenate([b_shift, b_scale], axis=1)      # [1, 2D]
    inv_std = 1.0 / std                                      # [1, D]

    # Batch tile: multiple of 8 sublanes when tiling, else the full (small) batch.
    TB = min(tb, B)
    if TB < B:
        assert TB % 8 == 0, "batch tile must be a multiple of 8 sublanes"

    num_tiles = pl.cdiv(B, TB)
    Bp = num_tiles * TB
    if Bp != B:
        pad = Bp - B
        x = jnp.pad(x, ((0, pad), (0, 0)))
        context = jnp.pad(context, ((0, pad), (0, 0)))

    out = pl.pallas_call(
        _flow_logprob_kernel,
        grid=(num_tiles,),
        in_specs=[
            pl.BlockSpec((TB, D), lambda i: (i, 0)),      # x           (tiled)
            pl.BlockSpec((TB, C), lambda i: (i, 0)),      # context     (tiled)
            pl.BlockSpec((1, D), lambda i: (0, 0)),       # mean        (resident)
            pl.BlockSpec((1, D), lambda i: (0, 0)),       # 1/std       (resident)
            pl.BlockSpec((C, 2 * D), lambda i: (0, 0)),   # W  [shift|scale]
            pl.BlockSpec((1, 2 * D), lambda i: (0, 0)),   # b  [shift|scale]
        ],
        out_specs=pl.BlockSpec((TB, 1), lambda i: (i, 0)),
        out_shape=jax.ShapeDtypeStruct((Bp, 1), jnp.float32),
        compiler_params=pltpu.CompilerParams(
            dimension_semantics=("parallel",),
            vmem_limit_bytes=32 * 1024 * 1024,
        ),
    )(x, context, mean, inv_std, w_cat, b_cat)

    return out[:B, 0]  # [B]


def _reference_log_prob(x, context, mean, std, w_shift, b_shift, w_scale, b_scale):
    z = (x - mean) / std
    shift = context @ w_shift + b_shift
    log_scale = context @ w_scale + b_scale
    u = (z - shift) * np.exp(-log_scale)
    D = u.shape[-1]
    base = -0.5 * np.sum(u * u, axis=-1) - 0.5 * D * math.log(2.0 * math.pi)
    return base - np.sum(log_scale, axis=-1)


if __name__ == "__main__":
    # Small but non-trivial: exercises multi-tile grid (tb=128 -> 2 tiles) and the
    # pad-to-tile path (200 -> 256 rows).
    B, D, C = 200, 32, 16

    key = jax.random.PRNGKey(0)
    kx, kc, km, ks, kws, kbs, kwl, kbl = jax.random.split(key, 8)

    x = jax.random.normal(kx, (B, D), dtype=jnp.float32)
    context = jax.random.normal(kc, (B, C), dtype=jnp.float32)

    # deterministic synthetic parameters (standardizer + conditional affine flow)
    mean = 0.1 * jax.random.normal(km, (1, D), dtype=jnp.float32)
    std = 1.0 + 0.05 * jax.random.uniform(ks, (1, D), dtype=jnp.float32)
    w_shift = 0.1 * jax.random.normal(kws, (C, D), dtype=jnp.float32)
    b_shift = 0.01 * jax.random.normal(kbs, (1, D), dtype=jnp.float32)
    w_scale = 0.05 * jax.random.normal(kwl, (C, D), dtype=jnp.float32)
    b_scale = 0.01 * jax.random.normal(kbl, (1, D), dtype=jnp.float32)

    log_prob = flow_wrapper_log_prob(
        x, context, mean, std, w_shift, b_shift, w_scale, b_scale, tb=128)
    log_prob = jax.block_until_ready(log_prob)

    ref = _reference_log_prob(
        np.asarray(x), np.asarray(context), np.asarray(mean), np.asarray(std),
        np.asarray(w_shift), np.asarray(b_shift), np.asarray(w_scale),
        np.asarray(b_scale))

    assert log_prob.shape == (B,)
    assert np.allclose(np.asarray(log_prob), ref, rtol=1e-4, atol=1e-4)
    print("KERNEL_OK")
</pallas_src>

<mosaic_0001>
module attributes {stable_mosaic.version = 11 : i64} {
  func.func @_flow_logprob_kernel(%arg0: i32, %arg1: memref<128x32xf32, #tpu.memory_space<vmem>>, %arg2: memref<128x16xf32, #tpu.memory_space<vmem>>, %arg3: memref<1x32xf32, #tpu.memory_space<vmem>>, %arg4: memref<1x32xf32, #tpu.memory_space<vmem>>, %arg5: memref<16x64xf32, #tpu.memory_space<vmem>>, %arg6: memref<1x64xf32, #tpu.memory_space<vmem>>, %arg7: memref<128x1xf32, #tpu.memory_space<vmem>>) attributes {dimension_semantics = [#tpu.dimension_semantics<parallel>], iteration_bounds = array<i64: 2>, scalar_prefetch = 0 : i64, scratch_operands = 0 : i64, tpu.core_type = #tpu.core_type<tc>, window_params = [{transform_indices = @transform_0, window_bounds = array<i64: 128, 32>}, {transform_indices = @transform_1, window_bounds = array<i64: 128, 16>}, {pipeline_mode = #tpu.pipeline_mode<synchronous>, transform_indices = @transform_2, window_bounds = array<i64: 1, 32>}, {pipeline_mode = #tpu.pipeline_mode<synchronous>, transform_indices = @transform_3, window_bounds = array<i64: 1, 32>}, {pipeline_mode = #tpu.pipeline_mode<synchronous>, transform_indices = @transform_4, window_bounds = array<i64: 16, 64>}, {pipeline_mode = #tpu.pipeline_mode<synchronous>, transform_indices = @transform_5, window_bounds = array<i64: 1, 64>}, {transform_indices = @transform_6, window_bounds = array<i64: 128, 1>}]} {
    %c0 = arith.constant 0 : index
    %c0_0 = arith.constant 0 : index
    %0 = vector.load %arg1[%c0, %c0_0] : memref<128x32xf32, #tpu.memory_space<vmem>>, vector<128x32xf32>
    %c0_1 = arith.constant 0 : index
    %c0_2 = arith.constant 0 : index
    %1 = vector.load %arg3[%c0_1, %c0_2] : memref<1x32xf32, #tpu.memory_space<vmem>>, vector<1x32xf32>
    %2 = vector.broadcast %1 : vector<1x32xf32> to vector<128x32xf32>
    %3 = arith.subf %0, %2 : vector<128x32xf32>
    %c0_3 = arith.constant 0 : index
    %c0_4 = arith.constant 0 : index
    %4 = vector.load %arg4[%c0_3, %c0_4] : memref<1x32xf32, #tpu.memory_space<vmem>>, vector<1x32xf32>
    %5 = vector.broadcast %4 : vector<1x32xf32> to vector<128x32xf32>
    %6 = arith.mulf %3, %5 : vector<128x32xf32>
    %c0_5 = arith.constant 0 : index
    %c0_6 = arith.constant 0 : index
    %7 = vector.load %arg2[%c0_5, %c0_6] : memref<128x16xf32, #tpu.memory_space<vmem>>, vector<128x16xf32>
    %c0_7 = arith.constant 0 : index
    %c0_8 = arith.constant 0 : index
    %8 = vector.load %arg5[%c0_7, %c0_8] : memref<16x64xf32, #tpu.memory_space<vmem>>, vector<16x64xf32>
    %cst = arith.constant dense<0.000000e+00> : vector<128x64xf32>
    %9 = tpu.matmul %7, %8, %cst {dimension_numbers = #tpu.dot_dimension_numbers<[1], [0], [0], [1], [0, 0, 1, 1], [], []>} : vector<128x16xf32>, vector<16x64xf32>, vector<128x64xf32> -> vector<128x64xf32>
    %c0_9 = arith.constant 0 : index
    %c0_10 = arith.constant 0 : index
    %10 = vector.load %arg6[%c0_9, %c0_10] : memref<1x64xf32, #tpu.memory_space<vmem>>, vector<1x64xf32>
    %11 = vector.broadcast %10 : vector<1x64xf32> to vector<128x64xf32>
    %12 = arith.addf %9, %11 : vector<128x64xf32>
    %13 = vector.extract_strided_slice %12 {offsets = [0, 0], sizes = [128, 32], strides = [1, 1]} : vector<128x64xf32> to vector<128x32xf32>
    %14 = vector.extract_strided_slice %12 {offsets = [0, 32], sizes = [128, 32], strides = [1, 1]} : vector<128x64xf32> to vector<128x32xf32>
    %15 = arith.subf %6, %13 : vector<128x32xf32>
    %cst_11 = arith.constant 0.000000e+00 : f32
    %16 = vector.broadcast %cst_11 : f32 to vector<128x32xf32>
    %17 = arith.subf %16, %14 : vector<128x32xf32>
    %18 = math.exp %17 : vector<128x32xf32>
    %19 = arith.mulf %15, %18 : vector<128x32xf32>
    %20 = arith.mulf %19, %19 : vector<128x32xf32>
    %cst_12 = arith.constant -5.000000e-01 : f32
    %21 = vector.broadcast %cst_12 : f32 to vector<128x32xf32>
    %22 = arith.mulf %21, %20 : vector<128x32xf32>
    %23 = arith.subf %22, %14 : vector<128x32xf32>
    %cst_13 = arith.constant dense<0.000000e+00> : vector<128xf32>
    %24 = vector.multi_reduction <add>, %23, %cst_13 [1] : vector<128x32xf32> to vector<128xf32>
    %25 = vector.shape_cast %24 : vector<128xf32> to vector<128x1xf32>
    %cst_14 = arith.constant 29.4060326 : f32
    %26 = vector.broadcast %cst_14 : f32 to vector<128x1xf32>
    %27 = arith.subf %25, %26 : vector<128x1xf32>
    %c0_15 = arith.constant 0 : index
    %c0_16 = arith.constant 0 : index
    %28 = vector.load %arg7[%c0_15, %c0_16] : memref<128x1xf32, #tpu.memory_space<vmem>>, vector<128x1xf32>
    tpu.vector_store %arg7[%c0_15, %c0_16], %27 {strides = array<i32>} : memref<128x1xf32, #tpu.memory_space<vmem>>, vector<128x1xf32>,
    return
  }
  func.func @transform_0(%arg0: i32) -> (i32, i32) {
    %c0_i32 = arith.constant 0 : i32
    %c0_i32_0 = arith.constant 0 : i32
    return %arg0, %c0_i32 : i32, i32
  }
  func.func @transform_1(%arg0: i32) -> (i32, i32) {
    %c0_i32 = arith.constant 0 : i32
    %c0_i32_0 = arith.constant 0 : i32
    return %arg0, %c0_i32 : i32, i32
  }
  func.func @transform_2(%arg0: i32) -> (i32, i32) {
    %c0_i32 = arith.constant 0 : i32
    %c0_i32_0 = arith.constant 0 : i32
    %c0_i32_1 = arith.constant 0 : i32
    return %c0_i32, %c0_i32_0 : i32, i32
  }
  func.func @transform_3(%arg0: i32) -> (i32, i32) {
    %c0_i32 = arith.constant 0 : i32
    %c0_i32_0 = arith.constant 0 : i32
    %c0_i32_1 = arith.constant 0 : i32
    return %c0_i32, %c0_i32_0 : i32, i32
  }
  func.func @transform_4(%arg0: i32) -> (i32, i32) {
    %c0_i32 = arith.constant 0 : i32
    %c0_i32_0 = arith.constant 0 : i32
    %c0_i32_1 = arith.constant 0 : i32
    return %c0_i32, %c0_i32_0 : i32, i32
  }
  func.func @transform_5(%arg0: i32) -> (i32, i32) {
    %c0_i32 = arith.constant 0 : i32
    %c0_i32_0 = arith.constant 0 : i32
    %c0_i32_1 = arith.constant 0 : i32
    return %c0_i32, %c0_i32_0 : i32, i32
  }
  func.func @transform_6(%arg0: i32) -> (i32, i32) {
    %c0_i32 = arith.constant 0 : i32
    %c0_i32_0 = arith.constant 0 : i32
    return %arg0, %c0_i32 : i32, i32
  }
}

</mosaic_0001>

<bundles_post_ra>
// kernel: tpu_custom_call.1
= control target key start
LH: loop header
LB: loop body
LE: loop exit
PB: predicated region body
PF: predicated region fallthrough
CT: control target
= control target key end

     0   :  { %s1149_s21 = smov 0   ;;  %s1475_s0 = inlined_call_operand.vmem [shape: f32[256,32], index: 0, kind: input, shape index: {}]   ;;  %s1476_s1 = inlined_call_operand.vmem [shape: f32[256,16], index: 1, kind: input, shape index: {}]   ;;  %s1477_s2 = inlined_call_operand.vmem [shape: f32[1,32], index: 2, kind: input, shape index: {}]   ;;  %s1478_s3 = inlined_call_operand.vmem [shape: f32[1,32], index: 3, kind: input, shape index: {}]   ;;  %s1479_s4 = inlined_call_operand.vmem [shape: f32[16,64], index: 4, kind: input, shape index: {}]   ;;  %s1480_s5 = inlined_call_operand.vmem [shape: f32[1,64], index: 5, kind: input, shape index: {}]   ;;  %s1481_s6 = inlined_call_operand.vmem [shape: f32[256,1], index: 6, kind: output, shape index: {}]  }
   0x1 LB: > { %s964_s22 = sadd.s32 4294967295, %s1111_s21   ;;  %p968_p0 = scmp.ge.s32.totalorder %s1111_s21, 1  ;;  %s1111_s21 = sphi %s1149_s21, %s16_s21  }
   0x2   : > { %p224_p1 = scmp.lt.s32.totalorder %s1111_s21, 3 }
   0x4   : > { %p225_p2 = pnand %p968_p0, %p224_p1 }
   0x5   : > { %v355_v0 = vld [vmem:[%s1479_s4] sm:$0xff] (!%p225_p2)  ;;  %v356_v1 = vld [vmem:[%s1479_s4 + $0x8] sm:$0xff] (!%p225_p2)  ;;  %s969_s27 = sshll.u32 (!%p225_p2), %s964_s22, 4  ;;  %vm364_vm0 = vcmask (!%p225_p2), 130048   ;;  %s1113_s10 = smov (!%p225_p2), 96   ;;  %vm814_vm1 = vcmask (!%p225_p2), 261120  }
   0x6   : > { %228 = sbr.rel (%p225_p2) target bundleno = 560 (0x230), region = 44  ;;  %v1058_v2 = vpack.c.bf16 (!%p225_p2), %v356_v1, %v355_v0  ;;  %p260_p3 = scmp.lt.s32.totalorder (!%p225_p2), %s969_s27, 31  ;;  %v1188_v19 = vld [vmem:[%s1480_s5] ss:$0 sm:$0xff] (!%p225_p2)  ;;  %vm879_vm2 = vcmask (!%p225_p2), 7168  }
   0x8   : > { %1059 = vmatprep.subr.bf16.mxu0 (!%p225_p2), %v1058_v2  ;;  %1062 = vmatprep.subr.bf16.mxu1 (!%p225_p2), %v1058_v2 }
   0x9   : > { %1061 = vmatpush3.bf16.msra.mxu0 (!%p225_p2), %v1058_v2  ;;  %1063 = vmatpush3.bf16.msra.mxu1 (!%p225_p2), %v1058_v2 }
   0xd   : > { %s1483_s27 = smov (!%p260_p3, %s969_s27), 31 }
   0xe   : > { %s1163_s28 = sshll.u32 %s1483_s27, 3 }
   0xf   : > { %s269_s7 = scalar_lea.vmem %s1476_s1, %s1163_s28  ;;  %s1318_s13 = scalar_lea.vmem %s1475_s0, %s1163_s28 }
  0x10   : > { %v339_v3 = vld [vmem:[%s269_s7] sm:$0xff]  ;;  %v340_v4 = vld [vmem:[%s269_s7 + $0x8] sm:$0xff]  ;;  %v341_v7 = vld [vmem:[%s269_s7 + $0x10] sm:$0xff]  ;;  %s1438_s20 = scalar_lea.vmem %s1481_s6, %s1163_s28 }
  0x11   : > { %v347_v5 = vld [vmem:[%s269_s7 + $0x40] sm:$0xff]  ;;  %1034 = vmatprep.mubr.msk.f32.mxu0 %vm364_vm0, %v339_v3  ;;  %v348_v6 = vld [vmem:[%s269_s7 + $0x48] sm:$0xff]  ;;  %v349_v8 = vld [vmem:[%s269_s7 + $0x50] sm:$0xff] }
  0x12   : > { %1046 = vmatprep.mubr.msk.f32.mxu1 %vm364_vm0, %v347_v5  ;;  %1035 = vmatmul.mubr.msk.f32.vlgmr.msra.gmra.mrb[0].mxu0 %vm364_vm0, %v340_v4  ;;  %v342_v9 = vld [vmem:[%s269_s7 + $0x18] sm:$0xff]  ;;  %v343_v11 = vld [vmem:[%s269_s7 + $0x20] sm:$0xff]  ;;  %v344_v13 = vld [vmem:[%s269_s7 + $0x28] sm:$0xff] }
  0x13   : > { %1047 = vmatmul.mubr.msk.f32.vlgmr.msra.gmra.mrb[0].mxu1 %vm364_vm0, %v348_v6  ;;  %1037 = vmatprep.mubr.msk.f32.mxu0 %vm364_vm0, %v341_v7  ;;  %v350_v10 = vld [vmem:[%s269_s7 + $0x58] sm:$0xff]  ;;  %v351_v12 = vld [vmem:[%s269_s7 + $0x60] sm:$0xff]  ;;  %v352_v14 = vld [vmem:[%s269_s7 + $0x68] sm:$0xff] }
  0x14   : > { %1049 = vmatprep.mubr.msk.f32.mxu1 %vm364_vm0, %v349_v8  ;;  %v345_v15 = vld [vmem:[%s269_s7 + $0x30] sm:$0xff]  ;;  %v346_v17 = vld [vmem:[%s269_s7 + $0x38] sm:$0xff] }
  0x15   : > { %v353_v16 = vld [vmem:[%s269_s7 + $0x70] sm:$0xff]  ;;  %v354_v18 = vld [vmem:[%s269_s7 + $0x78] sm:$0xff] }
  0x16   : > { %1038 = vmatmul.mubr.msk.f32.gmra.mrb[2].mxu0 %vm364_vm0, %v342_v9 }
  0x17   : > { %1050 = vmatmul.mubr.msk.f32.gmra.mrb[2].mxu1 %vm364_vm0, %v350_v10  ;;  %1040 = vmatprep.mubr.msk.f32.mxu0 %vm364_vm0, %v343_v11 }
  0x18   : > { %1052 = vmatprep.mubr.msk.f32.mxu1 %vm364_vm0, %v351_v12 }
  0x1a   : > { %1041 = vmatmul.mubr.msk.f32.gmra.mrb[4].mxu0 %vm364_vm0, %v344_v13 }
  0x1b   : > { %1053 = vmatmul.mubr.msk.f32.gmra.mrb[4].mxu1 %vm364_vm0, %v352_v14  ;;  %1043 = vmatprep.mubr.msk.f32.mxu0 %vm364_vm0, %v345_v15 }
  0x1c   : > { %1055 = vmatprep.mubr.msk.f32.mxu1 %vm364_vm0, %v353_v16 }
  0x1e   : > { %1044 = vmatmul.mubr.msk.f32.gmra.mrb[6].mxu0 %vm364_vm0, %v346_v17 }
  0x1f   : > { %1056 = vmatmul.mubr.msk.f32.gmra.mrb[6].mxu1 %vm364_vm0, %v354_v18 }
  0xe5   : > { %v1036_v20 = vpop.f32.mrb[0].mxu0 }
  0xe6   : > { %v1048_v21 = vpop.f32.mrb[0].mxu1  ;;  %v1191_v22 = vadd.f32 %v1036_v20, %v1188_v19  ;;  %v479_v23 = vpop.f32.mrb[1].mxu0 }
  0xe7   : > { %v519_v24 = vpop.f32.mrb[1].mxu1  ;;  %v1194_v25 = vadd.f32 %v1188_v19, %v479_v23  ;;  %v1197_v26 = vadd.f32 %v1048_v21, %v1188_v19 }
  0xe8   : > { %752 = vrot.lane.b32.xlu1 %v1191_v22, %s1113_s10  ;;  %v1202_v27 = vadd.f32 %v1188_v19, %v519_v24  ;;  %v575_v37 = vsub.f32 0.0, %v1191_v22 }
  0xe9   : > { %750 = vrot.lane.b32.xlu0 %v1194_v25, %s1113_s10  ;;  %v1039_v28 = vpop.f32.mrb[2].mxu0  ;;  %v583_v33 = vsub.f32 0.0, %v1197_v26  ;;  %v574_v47 = vsub.f32 0.0, %v1194_v25 }
  0xea   : > { %v1051_v29 = vpop.f32.mrb[2].mxu1  ;;  %v489_v30 = vpop.f32.mrb[3].mxu0  ;;  %v1209_v32 = vadd.f32 %v1039_v28, %v1188_v19  ;;  %v592_v46 = vmul.f32 1.442695, %v575_v37  ;;  %v582_v55 = vsub.f32 0.0, %v1202_v27 }
  0xeb   : > { %v529_v31 = vpop.f32.mrb[3].mxu1  ;;  %v1213_v34 = vadd.f32 %v1188_v19, %v489_v30  ;;  %v1219_v40 = vadd.f32 %v1051_v29, %v1188_v19  ;;  %v608_v41 = vmul.f32 1.442695, %v583_v33  ;;  %v590_v54 = vmul.f32 1.442695, %v574_v47 }
  0xec   : > { %768 = vrot.lane.b32.xlu1 %v1197_v26, %s1113_s10  ;;  %v577_v42 = vsub.f32 0.0, %v1209_v32  ;;  %v1225_v43 = vadd.f32 %v1188_v19, %v529_v31  ;;  %v606_v60 = vmul.f32 1.442695, %v582_v55  ;;  %v1328_v55 = vld [vmem:[%s1477_s2] ss:$0 sm:$0xff] }
  0xed   : > { %766 = vrot.lane.b32.xlu0 %v1202_v27, %s1113_s10  ;;  %v1042_v35 = vpop.f32.mrb[4].mxu0  ;;  %1073 = vpow2.f32 %v608_v41  ;;  %v585_v52 = vsub.f32 0.0, %v1219_v40  ;;  %v576_v57 = vsub.f32 0.0, %v1213_v34 }
  0xee   : > { %v1054_v36 = vpop.f32.mrb[4].mxu1  ;;  %v499_v38 = vpop.f32.mrb[5].mxu0  ;;  %v1233_v50 = vadd.f32 %v1042_v35, %v1188_v19  ;;  %v596_v51 = vmul.f32 1.442695, %v577_v42  ;;  %1075 = vpow2.f32 %v592_v46  ;;  %v584_v61 = vsub.f32 0.0, %v1225_v43 }
  0xef   : > { %v539_v39 = vpop.f32.mrb[5].mxu1  ;;  %v1237_v53 = vadd.f32 %v1188_v19, %v499_v38  ;;  %v612_v58 = vmul.f32 1.442695, %v585_v52  ;;  %v1255_v62 = vadd.f32 %v1054_v36, %v1188_v19  ;;  %v594_v0 = vmul.f32 1.442695, %v576_v57  ;;  %v286_v52 = vld [vmem:[%s1318_s13 + $0x48] sm:$0xff] }
  0xf0   : > { %756 = vrot.lane.b32.xlu1 %v1209_v32, %s1113_s10  ;;  %1077 = vpow2.f32 %v596_v51  ;;  %v1260_v63 = vadd.f32 %v1188_v19, %v539_v39  ;;  %v579_v1 = vsub.f32 0.0, %v1233_v50  ;;  %v610_v2 = vmul.f32 1.442695, %v584_v61  ;;  %v278_v57 = vld [vmem:[%s1318_s13 + $0x8] sm:$0xff] }
  0xf1   : > { %754 = vrot.lane.b32.xlu0 %v1213_v34, %s1113_s10  ;;  %v1045_v44 = vpop.f32.mrb[6].mxu0  ;;  %1079 = vpow2.f32 %v590_v54  ;;  %v578_v3 = vsub.f32 0.0, %v1237_v53  ;;  %v587_v5 = vsub.f32 0.0, %v1255_v62  ;;  %v301_v61 = vsub.f32 %v278_v57, %v1328_v55 }
  0xf2   : > { %v1057_v45 = vpop.f32.mrb[6].mxu1  ;;  %v509_v48 = vpop.f32.mrb[7].mxu0  ;;  %v1245_v56 = vadd.f32 %v1045_v44, %v1188_v19  ;;  %1081 = vpow2.f32 %v612_v58  ;;  %v586_v7 = vsub.f32 0.0, %v1260_v63  ;;  %v600_v8 = vmul.f32 1.442695, %v579_v1 }
  0xf3   : > { %v549_v49 = vpop.f32.mrb[7].mxu1  ;;  %v1249_v59 = vadd.f32 %v1188_v19, %v509_v48  ;;  %1083 = vpow2.f32 %v606_v60  ;;  %v598_v9 = vmul.f32 1.442695, %v578_v3  ;;  %v616_v11 = vmul.f32 1.442695, %v587_v5  ;;  %v277_v3 = vld [vmem:[%s1318_s13] sm:$0xff] }
  0xf4   : > { %772 = vrot.lane.b32.xlu1 %v1219_v40, %s1113_s10  ;;  %1085 = vpow2.f32 %v594_v0  ;;  %v1271_v12 = vadd.f32 %v1057_v45, %v1188_v19  ;;  %v614_v14 = vmul.f32 1.442695, %v586_v7  ;;  %v1275_v15 = vadd.f32 %v1188_v19, %v549_v49  ;;  %v280_v0 = vld [vmem:[%s1318_s13 + $0x18] sm:$0xff] }
  0xf5   : > { %770 = vrot.lane.b32.xlu0 %v1225_v43, %s1113_s10  ;;  %1087 = vpow2.f32 %v610_v2  ;;  %v581_v16 = vsub.f32 0.0, %v1245_v56  ;;  %v580_v17 = vsub.f32 0.0, %v1249_v59  ;;  %v309_v58 = vsub.f32 %v286_v52, %v1328_v55  ;;  %v1341_v2 = vld [vmem:[%s1478_s3] ss:$0 sm:$0xff] }
  0xf6   : > { %1089 = vpow2.f32 %v600_v8  ;;  %v589_v20 = vsub.f32 0.0, %v1271_v12  ;;  %v588_v23 = vsub.f32 0.0, %v1275_v15  ;;  %v303_v5 = vsub.f32 %v280_v0, %v1328_v55 }
  0xf7   : > { %v1074_v4 = vpop.eup %1073  ;;  %1091 = vpow2.f32 %v598_v9  ;;  %v604_v19 = vmul.f32 1.442695, %v581_v16  ;;  %v602_v24 = vmul.f32 1.442695, %v580_v17  ;;  %v324_v7 = vmul.f32 %v1341_v2, %v301_v61  ;;  %v288_v9 = vld [vmem:[%s1318_s13 + $0x58] sm:$0xff] }
  0xf8   : > { %760 = vrot.lane.b32.xlu1 %v1233_v50, %s1113_s10  ;;  %v1076_v6 = vpop.eup %1075  ;;  %1093 = vpow2.f32 %v616_v11  ;;  %v620_v29 = vmul.f32 1.442695, %v589_v20  ;;  %v618_v31 = vmul.f32 1.442695, %v588_v23  ;;  %v300_v8 = vsub.f32 %v277_v3, %v1328_v55  ;;  %v285_v11 = vld [vmem:[%s1318_s13 + $0x40] sm:$0xff] }
  0xf9   : > { %758 = vrot.lane.b32.xlu0 %v1237_v53, %s1113_s10  ;;  %1095 = vpow2.f32 %v614_v14  ;;  %v326_v16 = vmul.f32 %v1341_v2, %v303_v5  ;;  %v311_v17 = vsub.f32 %v288_v9, %v1328_v55  ;;  %v559_v20 = vsub.f32 %v324_v7, %v1191_v22 }
  0xfa   : > { %v1078_v10 = vpop.eup %1077  ;;  %1097 = vpow2.f32 %v604_v19  ;;  %v308_v23 = vsub.f32 %v285_v11, %v1328_v55 }
  0xfb   : > { %v1080_v13 = vpop.eup %1079  ;;  %1099 = vpow2.f32 %v602_v24 }
  0xfc   : > { %764 = vrot.lane.b32.xlu1 %v1245_v56, %s1113_s10  ;;  %v1082_v18 = vpop.eup %1081  ;;  %1101 = vpow2.f32 %v620_v29  ;;  %v287_v29 = vld [vmem:[%s1318_s13 + $0x50] sm:$0xff] }
  0xfd   : > { %762 = vrot.lane.b32.xlu0 %v1249_v59, %s1113_s10  ;;  %v1084_v21 = vpop.eup %1083  ;;  %1103 = vpow2.f32 %v618_v31 }
  0xfe   : > { %v1086_v28 = vpop.eup %1085 }
  0xff   : > { %v1088_v30 = vpop.eup %1087 }
 0x100   : > { %656 = vrot.lane.b32.xlu1 %v1074_v4, %s1113_s10  ;;  %v1090_v33 = vpop.eup %1089  ;;  %v332_v4 = vmul.f32 %v1341_v2, %v309_v58 }
 0x101   : > { %640 = vrot.lane.b32.xlu0 %v1076_v6, %s1113_s10  ;;  %v1092_v35 = vpop.eup %1091 }
 0x102   : > { %v1094_v36 = vpop.eup %1093  ;;  %v567_v14 = vsub.f32 %v332_v4, %v1197_v26  ;;  %v561_v26 = vsub.f32 %v326_v16, %v1209_v32 }
 0x103   : > { %v1096_v37 = vpop.eup %1095 }
 0x104   : > { %644 = vrot.lane.b32.xlu1 %v1078_v10, %s1113_s10  ;;  %v1098_v38 = vpop.eup %1097 }
 0x105   : > { %638 = vrot.lane.b32.xlu0 %v1080_v13, %s1113_s10  ;;  %v1100_v39 = vpop.eup %1099  ;;  %v279_v13 = vld [vmem:[%s1318_s13 + $0x10] sm:$0xff] }
 0x106   : > { %v1102_v41 = vpop.eup %1101 }
 0x107   : > { %v1104_v42 = vpop.eup %1103 }
 0x108   : > { %660 = vrot.lane.b32.xlu1 %v1082_v18, %s1113_s10 }
 0x109   : > { %654 = vrot.lane.b32.xlu0 %v1084_v21, %s1113_s10  ;;  %v323_v21 = vmul.f32 %v1341_v2, %v300_v8 }
 0x10b   : > { %v558_v22 = vsub.f32 %v323_v21, %v1194_v25 }
 0x10c   : > { %642 = vrot.lane.b32.xlu1 %v1086_v28, %s1113_s10  ;;  %v302_v28 = vsub.f32 %v279_v13, %v1328_v55 }
 0x10d   : > { %658 = vrot.lane.b32.xlu0 %v1088_v30, %s1113_s10 }
 0x10e   : > { %v325_v58 = vmul.f32 %v1341_v2, %v302_v28 }
 0x110   : > { %648 = vrot.lane.b32.xlu1 %v1090_v33, %s1113_s10  ;;  %v334_v33 = vmul.f32 %v1341_v2, %v311_v17 }
 0x111   : > { %646 = vrot.lane.b32.xlu0 %v1092_v35, %s1113_s10  ;;  %v282_v35 = vld [vmem:[%s1318_s13 + $0x28] sm:$0xff] }
 0x112   : > { %v305_v32 = vsub.f32 %v282_v35, %v1328_v55  ;;  %v569_v4 = vsub.f32 %v334_v33, %v1219_v40  ;;  %v284_v33 = vld [vmem:[%s1318_s13 + $0x38] sm:$0xff]  ;;  %v283_v35 = vld [vmem:[%s1318_s13 + $0x30] sm:$0xff] }
 0x114   : > { %664 = vrot.lane.b32.xlu1 %v1094_v36, %s1113_s10 }
 0x115   : > { %662 = vrot.lane.b32.xlu0 %v1096_v37, %s1113_s10 }
 0x118   : > { %652 = vrot.lane.b32.xlu1 %v1098_v38, %s1113_s10  ;;  %v331_v38 = vmul.f32 %v1341_v2, %v308_v23  ;;  %v289_v23 = vld [vmem:[%s1318_s13 + $0x60] sm:$0xff] }
 0x119   : > { %650 = vrot.lane.b32.xlu0 %v1100_v39, %s1113_s10  ;;  %v310_v39 = vsub.f32 %v287_v29, %v1328_v55 }
 0x11a   : > { %v566_v9 = vsub.f32 %v331_v38, %v1202_v27  ;;  %v560_v27 = vsub.f32 %v325_v58, %v1213_v34  ;;  %v312_v38 = vsub.f32 %v289_v23, %v1328_v55 }
 0x11b   : > { %v333_v13 = vmul.f32 %v1341_v2, %v310_v39 }
 0x11c   : > { %668 = vrot.lane.b32.xlu1 %v1102_v41, %s1113_s10  ;;  %v281_v41 = vld [vmem:[%s1318_s13 + $0x20] sm:$0xff] }
 0x11d   : > { %666 = vrot.lane.b32.xlu0 %v1104_v42, %s1113_s10  ;;  %v304_v5 = vsub.f32 %v281_v41, %v1328_v55 }
 0x120   : > { %776 = vrot.lane.b32.xlu1 %v1255_v62, %s1113_s10 }
 0x121   : > { %774 = vrot.lane.b32.xlu0 %v1260_v63, %s1113_s10 }
 0x124   : > { %780 = vrot.lane.b32.xlu1 %v1271_v12, %s1113_s10 }
 0x125   : > { %778 = vrot.lane.b32.xlu0 %v1275_v15, %s1113_s10 }
 0x15a   : > { %v1302_v44 = vpop.permute.xlu1 %752 }
 0x15b   : > { %v1304_v45 = vpop.permute.xlu0 %750 }
 0x15e   : > { %v1306_v46 = vpop.permute.xlu1 %768 }
 0x15f   : > { %v1308_v47 = vpop.permute.xlu0 %766 }
 0x162   : > { %v1310_v48 = vpop.permute.xlu1 %756 }
 0x163   : > { %v1312_v49 = vpop.permute.xlu0 %754 }
 0x166   : > { %v1320_v51 = vpop.permute.xlu1 %772 }
 0x167   : > { %v1323_v54 = vpop.permute.xlu0 %770 }
 0x16a   : > { %v1332_v60 = vpop.permute.xlu1 %760 }
 0x16b   : > { %v1336_v1 = vpop.permute.xlu0 %758 }
 0x16e   : > { %v1346_v6 = vpop.permute.xlu1 %764 }
 0x16f   : > { %v1351_v10 = vpop.permute.xlu0 %762 }
 0x172   : > { %v657_v18 = vpop.permute.xlu1 %656 }
 0x173   : > { %v695_v19 = vmul.f32 %v657_v18, %v567_v14  ;;  %v641_v24 = vpop.permute.xlu0 %640 }
 0x174   : > { %v687_v30 = vmul.f32 %v641_v24, %v559_v20  ;;  %v290_v20 = vld [vmem:[%s1318_s13 + $0x68] sm:$0xff]  ;;  %v327_v24 = vmul.f32 %v1341_v2, %v304_v5 }
 0x175   : > { %v711_v31 = vmul.f32 %v695_v19, %v695_v19 }
 0x176   : > { %v703_v36 = vmul.f32 %v687_v30, %v687_v30  ;;  %v645_v37 = vpop.permute.xlu1 %644  ;;  %v568_v30 = vsub.f32 %v333_v13, %v1225_v43 }
 0x177   : > { %v727_v42 = vmul.f32 -0.5, %v711_v31  ;;  %v689_v52 = vmul.f32 %v645_v37, %v561_v26  ;;  %v639_v57 = vpop.permute.xlu0 %638  ;;  %v313_v26 = vsub.f32 %v290_v20, %v1328_v55 }
 0x178   : > { %v719_v61 = vmul.f32 -0.5, %v703_v36  ;;  %v686_v0 = vmul.f32 %v639_v57, %v558_v22  ;;  %v306_v57 = vsub.f32 %v283_v35, %v1328_v55 }
 0x179   : > { %v705_v3 = vmul.f32 %v689_v52, %v689_v52  ;;  %v807_v25 = vsub.f32 %v727_v42, %v1306_v46 }
 0x17a   : > { %v702_v7 = vmul.f32 %v686_v0, %v686_v0  ;;  %v661_v8 = vpop.permute.xlu1 %660  ;;  %v799_v11 = vsub.f32 %v719_v61, %v1302_v44  ;;  %v328_v44 = vmul.f32 %v1341_v2, %v305_v32  ;;  %v562_v0 = vsub.f32 %v327_v24, %v1237_v53 }
 0x17b   : > { %v721_v14 = vmul.f32 -0.5, %v705_v3  ;;  %v697_v16 = vmul.f32 %v661_v8, %v569_v4  ;;  %v655_v17 = vpop.permute.xlu0 %654  ;;  %v842_v18 = vsel %vm814_vm1, %v807_v25, 0.0  ;;  %v336_v32 = vmul.f32 %v1341_v2, %v313_v26  ;;  %v292_v3 = vld [vmem:[%s1318_s13 + $0x78] sm:$0xff]  ;;  %v291_v8 = vld [vmem:[%s1318_s13 + $0x70] sm:$0xff] }
 0x17c   : > { %v718_v40 = vmul.f32 -0.5, %v702_v7  ;;  %v694_v46 = vmul.f32 %v655_v17, %v566_v9  ;;  %843 = vadd.xlane.f32.xlu0 %v842_v18  ;;  %v818_v21 = vsel %vm814_vm1, %v799_v11, 0.0  ;;  %v563_v43 = vsub.f32 %v328_v44, %v1233_v50 }
 0x17d   : > { %v713_v19 = vmul.f32 %v697_v16, %v697_v16  ;;  %819 = vadd.xlane.f32.xlu1 %v818_v21  ;;  %v801_v34 = vsub.f32 %v721_v14, %v1310_v48  ;;  %v335_v7 = vmul.f32 %v1341_v2, %v312_v38  ;;  %v315_v16 = vsub.f32 %v292_v3, %v1328_v55 }
 0x17e   : > { %v710_v28 = vmul.f32 %v694_v46, %v694_v46  ;;  %v643_v29 = vpop.permute.xlu1 %642  ;;  %v798_v31 = vsub.f32 %v718_v40, %v1304_v45  ;;  %v307_v45 = vsub.f32 %v284_v33, %v1328_v55  ;;  %v329_v40 = vmul.f32 %v1341_v2, %v306_v57 }
 0x17f   : > { %v729_v36 = vmul.f32 -0.5, %v713_v19  ;;  %v688_v37 = vmul.f32 %v643_v29, %v560_v27  ;;  %v659_v22 = vpop.permute.xlu0 %658  ;;  %v824_v5 = vsel %vm814_vm1, %v801_v34, 0.0  ;;  %v571_v46 = vsub.f32 %v336_v32, %v1255_v62 }
 0x180   : > { %v726_v39 = vmul.f32 -0.5, %v710_v28  ;;  %v696_v41 = vmul.f32 %v659_v22, %v568_v30  ;;  %v815_v42 = vsel %vm814_vm1, %v798_v31, 0.0  ;;  %v570_v23 = vsub.f32 %v335_v7, %v1260_v63 }
 0x181   : > { %v704_v52 = vmul.f32 %v688_v37, %v688_v37  ;;  %816 = vadd.xlane.f32.xlu0 %v815_v42  ;;  %v809_v50 = vsub.f32 %v729_v36, %v1320_v51  ;;  %v314_v51 = vsub.f32 %v291_v8, %v1328_v55  ;;  %v338_v55 = vmul.f32 %v1341_v2, %v315_v16 }
 0x182   : > { %v712_v58 = vmul.f32 %v696_v41, %v696_v41  ;;  %v649_v61 = vpop.permute.xlu1 %648  ;;  %v806_v48 = vsub.f32 %v726_v39, %v1308_v47  ;;  %v330_v47 = vmul.f32 %v1341_v2, %v307_v45  ;;  %v564_v31 = vsub.f32 %v329_v40, %v1249_v59 }
 0x183   : > { %v691_v4 = vmul.f32 %v649_v61, %v563_v43  ;;  %v647_v25 = vpop.permute.xlu0 %646  ;;  %v720_v9 = vmul.f32 -0.5, %v704_v52  ;;  %v848_v19 = vsel %vm814_vm1, %v809_v50, 0.0  ;;  %v337_v26 = vmul.f32 %v1341_v2, %v314_v51 }
 0x184   : > { %v728_v11 = vmul.f32 -0.5, %v712_v58  ;;  %v690_v13 = vmul.f32 %v647_v25, %v562_v0  ;;  %v839_v14 = vsel %vm814_vm1, %v806_v48, 0.0  ;;  %v573_v38 = vsub.f32 %v338_v55, %v1271_v12 }
 0x185   : > { %v707_v53 = vmul.f32 %v691_v4, %v691_v4  ;;  %840 = vadd.xlane.f32.xlu1 %v839_v14  ;;  %825 = vadd.xlane.f32.xlu0 %v824_v5  ;;  %v800_v28 = vsub.f32 %v720_v9, %v1312_v49  ;;  %v572_v2 = vsub.f32 %v337_v26, %v1275_v15 }
 0x186   : > { %v706_v17 = vmul.f32 %v690_v13, %v690_v13  ;;  %v665_v18 = vpop.permute.xlu1 %664  ;;  %v808_v20 = vsub.f32 %v728_v11, %v1323_v54  ;;  %v565_v54 = vsub.f32 %v330_v47, %v1245_v56 }
 0x187   : > { %v663_v21 = vpop.permute.xlu0 %662  ;;  %v723_v27 = vmul.f32 -0.5, %v707_v53  ;;  %v699_v29 = vmul.f32 %v665_v18, %v571_v46  ;;  %v821_v37 = vsel %vm814_vm1, %v800_v28, 0.0 }
 0x188   : > { %v722_v44 = vmul.f32 -0.5, %v706_v17  ;;  %v845_v24 = vsel %vm814_vm1, %v808_v20, 0.0  ;;  %v698_v30 = vmul.f32 %v663_v21, %v570_v23 }
 0x189   : > { %846 = vadd.xlane.f32.xlu1 %v845_v24  ;;  %849 = vadd.xlane.f32.xlu0 %v848_v19  ;;  %v803_v22 = vsub.f32 %v723_v27, %v1332_v60  ;;  %v715_v56 = vmul.f32 %v699_v29, %v699_v29 }
 0x18a   : > { %v653_v62 = vpop.permute.xlu1 %652  ;;  %v802_v63 = vsub.f32 %v722_v44, %v1336_v1  ;;  %v714_v59 = vmul.f32 %v698_v30, %v698_v30 }
 0x18b   : > { %v693_v33 = vmul.f32 %v653_v62, %v565_v54  ;;  %v651_v35 = vpop.permute.xlu0 %650  ;;  %v830_v43 = vsel %vm814_vm1, %v803_v22, 0.0  ;;  %v731_v45 = vmul.f32 -0.5, %v715_v56 }
 0x18c   : > { %v692_v36 = vmul.f32 %v651_v35, %v564_v31  ;;  %v827_v49 = vsel %vm814_vm1, %v802_v63, 0.0  ;;  %v730_v60 = vmul.f32 -0.5, %v714_v59 }
 0x18d   : > { %v709_v34 = vmul.f32 %v693_v33, %v693_v33  ;;  %828 = vadd.xlane.f32.xlu1 %v827_v49  ;;  %822 = vadd.xlane.f32.xlu0 %v821_v37 }
 0x18e   : > { %v708_v39 = vmul.f32 %v692_v36, %v692_v36  ;;  %v669_v1 = vpop.permute.xlu1 %668 }
 0x18f   : > { %v701_v41 = vmul.f32 %v669_v1, %v573_v38  ;;  %v667_v42 = vpop.permute.xlu0 %666  ;;  %v725_v57 = vmul.f32 -0.5, %v709_v34 }
 0x190   : > { %v700_v52 = vmul.f32 %v667_v42, %v572_v2  ;;  %v724_v58 = vmul.f32 -0.5, %v708_v39 }
 0x191   : > { %831 = vadd.xlane.f32.xlu0 %v830_v43  ;;  %v717_v0 = vmul.f32 %v701_v41, %v701_v41  ;;  %v805_v15 = vsub.f32 %v725_v57, %v1346_v6 }
 0x192   : > { %v777_v61 = vpop.permute.xlu1 %776  ;;  %v716_v12 = vmul.f32 %v700_v52, %v700_v52  ;;  %v804_v7 = vsub.f32 %v724_v58, %v1351_v10 }
 0x193   : > { %v811_v48 = vsub.f32 %v731_v45, %v777_v61  ;;  %v775_v32 = vpop.permute.xlu0 %774  ;;  %v733_v50 = vmul.f32 -0.5, %v717_v0  ;;  %v836_v13 = vsel %vm814_vm1, %v805_v15, 0.0 }
 0x194   : > { %v810_v3 = vsub.f32 %v730_v60, %v775_v32  ;;  %v732_v9 = vmul.f32 -0.5, %v716_v12  ;;  %v833_v53 = vsel %vm814_vm1, %v804_v7, 0.0 }
 0x195   : > { %v854_v4 = vsel %vm814_vm1, %v811_v48, 0.0 }
 0x196   : > { %v781_v25 = vpop.permute.xlu1 %780  ;;  %855 = vadd.xlane.f32.xlu0 %v854_v4  ;;  %v851_v5 = vsel %vm814_vm1, %v810_v3, 0.0 }
 0x197   : > { %v779_v8 = vpop.permute.xlu0 %778  ;;  %852 = vadd.xlane.f32.xlu1 %v851_v5  ;;  %v813_v11 = vsub.f32 %v733_v50, %v781_v25 }
 0x198   : > { %v812_v14 = vsub.f32 %v732_v9, %v779_v8 }
 0x199   : > { %v860_v6 = vsel %vm814_vm1, %v813_v11, 0.0 }
 0x19a   : > { %837 = vadd.xlane.f32.xlu0 %v836_v13  ;;  %v857_v47 = vsel %vm814_vm1, %v812_v14, 0.0 }
 0x19b   : > { %834 = vadd.xlane.f32.xlu1 %v833_v53 }
 0x19e   : > { %861 = vadd.xlane.f32.xlu0 %v860_v6 }
 0x19f   : > { %858 = vadd.xlane.f32.xlu1 %v857_v47 }
 0x209   : > { %v844_v10 = vpop.xlane.xlu0 %843 }
 0x20a   : > { %v1003_v16 = vadd.f32 -29.406033, %v844_v10  ;;  %v820_v17 = vpop.xlane.xlu1 %819 }
 0x20b   : > { %v995_v18 = vadd.f32 -29.406033, %v820_v17 }
 0x20c   : > { %889 = vst.msk [vmem:[%s1438_s20 + $0x48] sm:$0xff] %vm879_vm2, %v1003_v16 }
 0x20d   : > { %881 = vst.msk [vmem:[%s1438_s20 + $0x8] sm:$0xff] %vm879_vm2, %v995_v18 }
 0x20e   : > { %v817_v20 = vpop.xlane.xlu0 %816 }
 0x20f   : > { %v994_v40 = vadd.f32 -29.406033, %v817_v20 }
 0x211   : > { %880 = vst.msk [vmem:[%s1438_s20] sm:$0xff] %vm879_vm2, %v994_v40 }
 0x212   : > { %v841_v51 = vpop.xlane.xlu1 %840  ;;  %v826_v46 = vpop.xlane.xlu0 %825 }
 0x213   : > { %v1002_v21 = vadd.f32 -29.406033, %v841_v51  ;;  %v997_v23 = vadd.f32 -29.406033, %v826_v46 }
 0x215   : > { %888 = vst.msk [vmem:[%s1438_s20 + $0x40] sm:$0xff] %vm879_vm2, %v1002_v21  ;;  %883 = vst.msk [vmem:[%s1438_s20 + $0x18] sm:$0xff] %vm879_vm2, %v997_v23 }
 0x216   : > { %v847_v19 = vpop.xlane.xlu1 %846  ;;  %v850_v27 = vpop.xlane.xlu0 %849 }
 0x217   : > { %v1004_v44 = vadd.f32 -29.406033, %v847_v19  ;;  %v1005_v24 = vadd.f32 -29.406033, %v850_v27 }
 0x219   : > { %890 = vst.msk [vmem:[%s1438_s20 + $0x50] sm:$0xff] %vm879_vm2, %v1004_v44  ;;  %891 = vst.msk [vmem:[%s1438_s20 + $0x58] sm:$0xff] %vm879_vm2, %v1005_v24 }
 0x21a   : > { %v829_v28 = vpop.xlane.xlu1 %828  ;;  %v823_v29 = vpop.xlane.xlu0 %822 }
 0x21b   : > { %v998_v54 = vadd.f32 -29.406033, %v829_v28  ;;  %v996_v55 = vadd.f32 -29.406033, %v823_v29 }
 0x21d   : > { %884 = vst.msk [vmem:[%s1438_s20 + $0x20] sm:$0xff] %vm879_vm2, %v998_v54  ;;  %882 = vst.msk [vmem:[%s1438_s20 + $0x10] sm:$0xff] %vm879_vm2, %v996_v55 }
 0x21e   : > { %v832_v30 = vpop.xlane.xlu0 %831 }
 0x21f   : > { %v999_v62 = vadd.f32 -29.406033, %v832_v30 }
 0x221   : > { %885 = vst.msk [vmem:[%s1438_s20 + $0x28] sm:$0xff] %vm879_vm2, %v999_v62 }
 0x223   : > { %v856_v31 = vpop.xlane.xlu0 %855 }
 0x224   : > { %v1007_v63 = vadd.f32 -29.406033, %v856_v31  ;;  %v853_v26 = vpop.xlane.xlu1 %852 }
 0x225   : > { %v1006_v33 = vadd.f32 -29.406033, %v853_v26 }
 0x226   : > { %893 = vst.msk [vmem:[%s1438_s20 + $0x68] sm:$0xff] %vm879_vm2, %v1007_v63 }
 0x227   : > { %892 = vst.msk [vmem:[%s1438_s20 + $0x60] sm:$0xff] %vm879_vm2, %v1006_v33  ;;  %v838_v35 = vpop.xlane.xlu0 %837 }
 0x228   : > { %v1001_v36 = vadd.f32 -29.406033, %v838_v35  ;;  %v835_v49 = vpop.xlane.xlu1 %834 }
 0x229   : > { %v1000_v37 = vadd.f32 -29.406033, %v835_v49 }
 0x22a   : > { %887 = vst.msk [vmem:[%s1438_s20 + $0x38] sm:$0xff] %vm879_vm2, %v1001_v36 }
 0x22b   : > { %886 = vst.msk [vmem:[%s1438_s20 + $0x30] sm:$0xff] %vm879_vm2, %v1000_v37  ;;  %v862_v22 = vpop.xlane.xlu0 %861 }
 0x22c   : > { %v1009_v56 = vadd.f32 -29.406033, %v862_v22  ;;  %v859_v34 = vpop.xlane.xlu1 %858 }
 0x22d   : > { %v1008_v38 = vadd.f32 -29.406033, %v859_v34 }
 0x22e   : > { %895 = vst.msk [vmem:[%s1438_s20 + $0x78] sm:$0xff] %vm879_vm2, %v1009_v56 }
 0x22f   : > { %894 = vst.msk [vmem:[%s1438_s20 + $0x70] sm:$0xff] %vm879_vm2, %v1008_v38 }
 0x230 PF: > { %s16_s21 = sadd.s32 1, %s1111_s21  }
 0x231   : > { %p13_p4 = scmp.ge.s32.totalorder %s16_s21, 4  }
 0x233   :  { %15 = sbr.rel (!%p13_p4) target bundleno = 1 (0x1), region = 77 }

</bundles_post_ra>
